<compile_context>
chip_gen: v7x
topology: tpu7x:2x2x1
jax: 0.10.0
libtpu: 0.0.40
codegen_flags: <defaults>
</compile_context>

<pallas_src>
import functools
import math

import jax
import jax.numpy as jnp
from jax import lax
from jax.experimental import pallas as pl
from jax.experimental.pallas import tpu as pltpu

SUBLANE_F32 = 8     # f32 sublane tile (rows of activations)
SUBLANE_BF16 = 16   # bf16 sublane tile (rows of weight matrices / contraction dims)


def _round_up(n, m):
    return (n + m - 1) // m * m


def transformer_kernel(
    x_ref,
    ln1_g_ref, ln1_b_ref,
    wqkv_ref, bqkv_ref,
    wp_ref, bp_ref,
    ln2_g_ref, ln2_b_ref,
    w1_ref, b1_ref,
    w2_ref, b2_ref,
    out_ref,
    *,
    q_k_size: int,
    e_true: int,
    s_true: int,
    dq_pad: int,
    dv_pad: int,
):
    f32, bf16 = jnp.float32, jnp.bfloat16
    x = x_ref[...]                                   # (S_pad, E_pad) f32
    S_pad, E_pad = x.shape
    inv_e = jnp.float32(1.0 / e_true)
    n_pad_cols = E_pad - e_true

    def layernorm(v, gamma, beta, eps=1e-5):
        """Two-pass LayerNorm over a (possibly zero-padded) last dim.

        Padded columns of `v`, `gamma`, `beta` are zero; sums are corrected so the
        result over the true columns matches the unpadded LayerNorm exactly and the
        padded output columns stay 0 (gamma/beta are 0 there).
        """
        mu = jnp.sum(v, axis=-1, keepdims=True) * inv_e
        d = v - mu
        ss = jnp.sum(d * d, axis=-1, keepdims=True)
        if n_pad_cols:
            # padded columns contribute exactly n_pad_cols * mu^2 to ss
            ss = ss - jnp.float32(n_pad_cols) * mu * mu
        var = ss * inv_e
        return d * lax.rsqrt(var + eps) * gamma + beta

    # ---- Attention block ----
    n1 = layernorm(x, ln1_g_ref[...], ln1_b_ref[...])

    # Fused Q|K|V projection: one wide matmul, bf16 operands, f32 accumulate.
    qkv = jnp.dot(n1.astype(bf16), wqkv_ref[...],
                  preferred_element_type=f32) + bqkv_ref[...]
    # Fold the 1/sqrt(dk) scale into q (O(S*Dk), cheaper than scaling (S,S) scores;
    # masked entries get overwritten anyway so the order is equivalent to the module).
    q = qkv[:, 0:dq_pad] * jnp.float32(1.0 / math.sqrt(q_k_size))
    k = qkv[:, dq_pad:2 * dq_pad]
    v = qkv[:, 2 * dq_pad:2 * dq_pad + dv_pad]

    # scores = q @ k.T, contracting the last dims directly (no explicit transpose).
    scores = lax.dot_general(q.astype(bf16), k.astype(bf16),
                             (((1,), (1,)), ((), ())),
                             preferred_element_type=f32)

    # Module does masked_fill_(tril(ones).bool(), -1e9): LOWER triangle INCLUDING the
    # diagonal is set to -1e9.  Single select in the common (unpadded) path.
    row = lax.broadcasted_iota(jnp.int32, scores.shape, 0)
    col = lax.broadcasted_iota(jnp.int32, scores.shape, 1)
    scores = jnp.where(col <= row, jnp.float32(-1000000000.0), scores)
    if S_pad > s_true:
        # Padded key columns must vanish entirely from the softmax (strictly more
        # negative than -1e9 so fully-masked rows keep identical module behavior).
        scores = jnp.where(col >= s_true,
                           jnp.float32(jnp.finfo(jnp.float32).min), scores)

    # Online-style softmax: normalize AFTER the PV matmul (O(S*Dv) scale instead of
    # an O(S^2) multiply; denominator reciprocal on the EUP approx slot).
    m = jnp.max(scores, axis=-1, keepdims=True)
    e = jnp.exp(scores - m)
    rowsum = jnp.sum(e, axis=-1, keepdims=True)
    att_un = jnp.dot(e.astype(bf16), v.astype(bf16), preferred_element_type=f32)
    # MultiHead residual adds its *input*, which is the post-LN tensor n1.
    att = att_un * pl.reciprocal(rowsum, approx=True) + n1

    # proj + Attention residual
    a = jnp.dot(att.astype(bf16), wp_ref[...],
                preferred_element_type=f32) + bp_ref[...] + x

    # ---- MLP block ----
    n2 = layernorm(a, ln2_g_ref[...], ln2_b_ref[...])
    h = jnp.dot(n2.astype(bf16), w1_ref[...],
                preferred_element_type=f32) + b1_ref[...]
    h = jnp.maximum(h, 0.0)
    out_ref[...] = jnp.dot(h.astype(bf16), w2_ref[...],
                           preferred_element_type=f32) + b2_ref[...] + a


def _derive_vmem_limit():
    """~3/4 of physical VMEM, capped: ~96 MiB on v5e/v6e (128 MiB), ~48 MiB on v7x."""
    try:
        cap = int(pltpu.get_tpu_info().vmem_capacity_bytes)
    except Exception:  # conservative fallback
        cap = 64 * 1024 * 1024
    return max(16 * 1024 * 1024, min(cap * 3 // 4, 96 * 1024 * 1024))


def transformer_forward(x, params, *, q_k_size):
    """x: (S, E) f32.  params: PyTorch-Linear weights pre-transposed to (in, out)."""
    S, E = x.shape
    Dq = params["wq"].shape[1]          # n_head * q_k_size
    Dv = params["wv"].shape[1]          # n_head * v_size (== E, module residual)
    M = params["w1"].shape[1]
    assert Dv == E, "module requires n_head * v_size == embedding_dim"

    # Minimal padding: sublane tiles only (no lane-128 inflation of contraction dims).
    S_pad = _round_up(S, SUBLANE_F32)
    E_pad = _round_up(E, SUBLANE_BF16)
    Dq_pad = _round_up(Dq, SUBLANE_BF16)
    Dv_pad = E_pad                       # Dv == E, must match for residual adds
    M_pad = _round_up(M, SUBLANE_BF16)
    bf16 = jnp.bfloat16

    def pad2(a, rows, cols):
        return jnp.pad(a, ((0, rows - a.shape[0]), (0, cols - a.shape[1])))

    # Zero padding; weights in bf16 (MXU operands), biases / LN params in f32.
    x_p = pad2(x, S_pad, E_pad)
    wqkv = jnp.concatenate(
        [pad2(params["wq"], E_pad, Dq_pad),
         pad2(params["wk"], E_pad, Dq_pad),
         pad2(params["wv"], E_pad, Dv_pad)], axis=1).astype(bf16)
    bqkv = jnp.concatenate(
        [pad2(params["bq"], 1, Dq_pad),
         pad2(params["bk"], 1, Dq_pad),
         pad2(params["bv"], 1, Dv_pad)], axis=1)
    wp = pad2(params["wp"], Dv_pad, E_pad).astype(bf16)
    bp = pad2(params["bp"], 1, E_pad)
    w1 = pad2(params["w1"], E_pad, M_pad).astype(bf16)
    b1 = pad2(params["b1"], 1, M_pad)
    w2 = pad2(params["w2"], M_pad, E_pad).astype(bf16)
    b2 = pad2(params["b2"], 1, E_pad)
    ln1_g = pad2(params["ln1_g"], 1, E_pad)
    ln1_b = pad2(params["ln1_b"], 1, E_pad)
    ln2_g = pad2(params["ln2_g"], 1, E_pad)
    ln2_b = pad2(params["ln2_b"], 1, E_pad)

    args = (x_p, ln1_g, ln1_b, wqkv, bqkv, wp, bp, ln2_g, ln2_b, w1, b1, w2, b2)

    # Advisory cost hint (true, unpadded dims).
    flops = 2 * S * (E * (2 * Dq + Dv) + S * Dq + S * Dv + Dv * E + E * M + M * E)
    bytes_accessed = sum(int(a.size) * a.dtype.itemsize for a in args)
    bytes_accessed += S_pad * E_pad * 4
    cost = pl.CostEstimate(flops=flops, transcendentals=S * S,
                           bytes_accessed=bytes_accessed)

    vmem_spec = pl.BlockSpec(memory_space=pltpu.MemorySpace.VMEM)
    out = pl.pallas_call(
        functools.partial(transformer_kernel, q_k_size=q_k_size, e_true=E,
                          s_true=S, dq_pad=Dq_pad, dv_pad=Dv_pad),
        out_shape=jax.ShapeDtypeStruct((S_pad, E_pad), jnp.float32),
        in_specs=[vmem_spec] * len(args),
        out_specs=vmem_spec,
        compiler_params=pltpu.CompilerParams(
            vmem_limit_bytes=_derive_vmem_limit()),
        cost_estimate=cost,
    )(*args)
    return out[:S, :E]


def make_params(key, embedding_dim, q_k_size, v_size, n_head, mlp_size):
    """Deterministic synthetic parameters (PyTorch Linear shapes, pre-transposed)."""
    E, H, Dk, Dv, M = embedding_dim, n_head, q_k_size, v_size, mlp_size
    ks = jax.random.split(key, 12)

    def lin(kw, kb, fan_in, fan_out):
        bound = 1.0 / math.sqrt(fan_in)
        w = jax.random.uniform(kw, (fan_in, fan_out), jnp.float32, -bound, bound)
        b = jax.random.uniform(kb, (1, fan_out), jnp.float32, -bound, bound)
        return w, b

    wq, bq = lin(ks[0], ks[1], E, H * Dk)
    wk, bk = lin(ks[2], ks[3], E, H * Dk)
    wv, bv = lin(ks[4], ks[5], E, H * Dv)
    wp, bp = lin(ks[6], ks[7], E, E)
    w1, b1 = lin(ks[8], ks[9], E, M)
    w2, b2 = lin(ks[10], ks[11], M, E)

    return {
        "ln1_g": jnp.ones((1, E), jnp.float32), "ln1_b": jnp.zeros((1, E), jnp.float32),
        "wq": wq, "bq": bq, "wk": wk, "bk": bk, "wv": wv, "bv": bv,
        "wp": wp, "bp": bp,
        "ln2_g": jnp.ones((1, E), jnp.float32), "ln2_b": jnp.zeros((1, E), jnp.float32),
        "w1": w1, "b1": b1, "w2": w2, "b2": b2,
    }


def _layernorm_ref(v, gamma, beta, eps=1e-5):
    mu = jnp.mean(v, axis=-1, keepdims=True)
    var = jnp.mean((v - mu) ** 2, axis=-1, keepdims=True)
    return (v - mu) * lax.rsqrt(var + eps) * gamma + beta


def reference_forward(x, p, *, q_k_size):
    """Pure-JAX reference mirroring the PyTorch forward (bf16 matmul operands,
    f32 accumulation, to match the kernel's precision choices)."""
    bf16, f32 = jnp.bfloat16, jnp.float32

    def mm(a, b):
        return jnp.dot(a.astype(bf16), b.astype(bf16), preferred_element_type=f32)

    n1 = _layernorm_ref(x, p["ln1_g"], p["ln1_b"])
    q = mm(n1, p["wq"]) + p["bq"]
    k = mm(n1, p["wk"]) + p["bk"]
    v = mm(n1, p["wv"]) + p["bv"]
    s = jnp.dot(q.astype(bf16), k.astype(bf16).T,
                preferred_element_type=f32) / math.sqrt(q_k_size)
    S = x.shape[0]
    mask = jnp.tril(jnp.ones((S, S), bool))          # lower triangle INCLUDING diag
    s = jnp.where(mask, -1e9, s)
    att = jnp.dot(jax.nn.softmax(s, axis=-1).astype(bf16), v.astype(bf16),
                  preferred_element_type=f32) + n1
    a = mm(att, p["wp"]) + p["bp"] + x
    n2 = _layernorm_ref(a, p["ln2_g"], p["ln2_b"])
    h = jnp.maximum(mm(n2, p["w1"]) + p["b1"], 0.0)
    return mm(h, p["w2"]) + p["b2"] + a


if __name__ == "__main__":
    # Small shapes consistent with the module: n_head * v_size == embedding_dim
    # (required for the `q_k_v + inputs` residual inside MultiHead).
    S, E, Dk, Dv, H, M = 8, 32, 8, 8, 4, 64

    key = jax.random.PRNGKey(0)
    kx, kp = jax.random.split(key)
    x = jax.random.normal(kx, (S, E), jnp.float32)
    params = make_params(kp, E, Dk, Dv, H, M)

    out = transformer_forward(x, params, q_k_size=Dk)
    out = jax.block_until_ready(out)

    ref = reference_forward(x, params, q_k_size=Dk)
    assert out.shape == (S, E)
    assert jnp.allclose(out, ref, atol=2.5e-2, rtol=2.5e-2), "mismatch vs JAX reference"

    print("KERNEL_OK")
</pallas_src>

<mosaic_0001>
module attributes {stable_mosaic.version = 11 : i64} {
  func.func @transformer_kernel(%arg0: memref<8x32xf32, #tpu.memory_space<vmem>>, %arg1: memref<1x32xf32, #tpu.memory_space<vmem>>, %arg2: memref<1x32xf32, #tpu.memory_space<vmem>>, %arg3: memref<32x96xbf16, #tpu.memory_space<vmem>>, %arg4: memref<1x96xf32, #tpu.memory_space<vmem>>, %arg5: memref<32x32xbf16, #tpu.memory_space<vmem>>, %arg6: memref<1x32xf32, #tpu.memory_space<vmem>>, %arg7: memref<1x32xf32, #tpu.memory_space<vmem>>, %arg8: memref<1x32xf32, #tpu.memory_space<vmem>>, %arg9: memref<32x64xbf16, #tpu.memory_space<vmem>>, %arg10: memref<1x64xf32, #tpu.memory_space<vmem>>, %arg11: memref<64x32xbf16, #tpu.memory_space<vmem>>, %arg12: memref<1x32xf32, #tpu.memory_space<vmem>>, %arg13: memref<8x32xf32, #tpu.memory_space<vmem>>) attributes {dimension_semantics = [], scalar_prefetch = 0 : i64, scratch_operands = 0 : i64, tpu.core_type = #tpu.core_type<tc>} {
    %c0 = arith.constant 0 : index
    %c0_0 = arith.constant 0 : index
    %0 = vector.load %arg0[%c0, %c0_0] : memref<8x32xf32, #tpu.memory_space<vmem>>, vector<8x32xf32>
    %c0_1 = arith.constant 0 : index
    %c0_2 = arith.constant 0 : index
    %1 = vector.load %arg1[%c0_1, %c0_2] : memref<1x32xf32, #tpu.memory_space<vmem>>, vector<1x32xf32>
    %c0_3 = arith.constant 0 : index
    %c0_4 = arith.constant 0 : index
    %2 = vector.load %arg2[%c0_3, %c0_4] : memref<1x32xf32, #tpu.memory_space<vmem>>, vector<1x32xf32>
    %cst = arith.constant dense<0.000000e+00> : vector<8xf32>
    %3 = vector.multi_reduction <add>, %0, %cst [1] : vector<8x32xf32> to vector<8xf32>
    %4 = vector.shape_cast %3 : vector<8xf32> to vector<8x1xf32>
    %cst_5 = arith.constant 3.125000e-02 : f32
    %5 = vector.broadcast %cst_5 : f32 to vector<8x1xf32>
    %6 = arith.mulf %4, %5 : vector<8x1xf32>
    %7 = vector.broadcast %6 : vector<8x1xf32> to vector<8x32xf32>
    %8 = arith.subf %0, %7 : vector<8x32xf32>
    %9 = arith.mulf %8, %8 : vector<8x32xf32>
    %cst_6 = arith.constant dense<0.000000e+00> : vector<8xf32>
    %10 = vector.multi_reduction <add>, %9, %cst_6 [1] : vector<8x32xf32> to vector<8xf32>
    %11 = vector.shape_cast %10 : vector<8xf32> to vector<8x1xf32>
    %cst_7 = arith.constant 3.125000e-02 : f32
    %12 = vector.broadcast %cst_7 : f32 to vector<8x1xf32>
    %13 = arith.mulf %11, %12 : vector<8x1xf32>
    %cst_8 = arith.constant 9.99999974E-6 : f32
    %14 = vector.broadcast %cst_8 : f32 to vector<8x1xf32>
    %15 = arith.addf %13, %14 : vector<8x1xf32>
    %16 = math.rsqrt %15 : vector<8x1xf32>
    %17 = vector.broadcast %16 : vector<8x1xf32> to vector<8x32xf32>
    %18 = arith.mulf %8, %17 : vector<8x32xf32>
    %19 = vector.broadcast %1 : vector<1x32xf32> to vector<8x32xf32>
    %20 = arith.mulf %18, %19 : vector<8x32xf32>
    %21 = vector.broadcast %2 : vector<1x32xf32> to vector<8x32xf32>
    %22 = arith.addf %20, %21 : vector<8x32xf32>
    %23 = arith.truncf %22 : vector<8x32xf32> to vector<8x32xbf16>
    %c0_9 = arith.constant 0 : index
    %c0_10 = arith.constant 0 : index
    %24 = vector.load %arg3[%c0_9, %c0_10] : memref<32x96xbf16, #tpu.memory_space<vmem>>, vector<32x96xbf16>
    %cst_11 = arith.constant dense<0.000000e+00> : vector<8x96xf32>
    %25 = tpu.matmul %23, %24, %cst_11 {dimension_numbers = #tpu.dot_dimension_numbers<[1], [0], [0], [1], [0, 0, 1, 1], [], []>} : vector<8x32xbf16>, vector<32x96xbf16>, vector<8x96xf32> -> vector<8x96xf32>
    %c0_12 = arith.constant 0 : index
    %c0_13 = arith.constant 0 : index
    %26 = vector.load %arg4[%c0_12, %c0_13] : memref<1x96xf32, #tpu.memory_space<vmem>>, vector<1x96xf32>
    %27 = vector.broadcast %26 : vector<1x96xf32> to vector<8x96xf32>
    %28 = arith.addf %25, %27 : vector<8x96xf32>
    %29 = vector.extract_strided_slice %28 {offsets = [0, 0], sizes = [8, 32], strides = [1, 1]} : vector<8x96xf32> to vector<8x32xf32>
    %cst_14 = arith.constant 0.353553385 : f32
    %30 = vector.broadcast %cst_14 : f32 to vector<8x32xf32>
    %31 = arith.mulf %29, %30 : vector<8x32xf32>
    %32 = vector.extract_strided_slice %28 {offsets = [0, 32], sizes = [8, 32], strides = [1, 1]} : vector<8x96xf32> to vector<8x32xf32>
    %33 = vector.extract_strided_slice %28 {offsets = [0, 64], sizes = [8, 32], strides = [1, 1]} : vector<8x96xf32> to vector<8x32xf32>
    %34 = arith.truncf %31 : vector<8x32xf32> to vector<8x32xbf16>
    %35 = arith.truncf %32 : vector<8x32xf32> to vector<8x32xbf16>
    %cst_15 = arith.constant dense<0.000000e+00> : vector<8x8xf32>
    %36 = tpu.matmul %34, %35, %cst_15 {dimension_numbers = #tpu.dot_dimension_numbers<[1], [1], [0], [0], [0, 0, 1, 0], [], []>} : vector<8x32xbf16>, vector<8x32xbf16>, vector<8x8xf32> -> vector<8x8xf32>
    %37 = tpu.iota {dimensions = array<i32: 0>} : vector<8x8xi32>
    %38 = tpu.iota {dimensions = array<i32: 1>} : vector<8x8xi32>
    %39 = arith.cmpi sle, %38, %37 : vector<8x8xi32>
    %cst_16 = arith.constant -1.000000e+09 : f32
    %40 = vector.broadcast %cst_16 : f32 to vector<8x8xf32>
    %41 = arith.select %39, %40, %36 : vector<8x8xi1>, vector<8x8xf32>
    %cst_17 = arith.constant dense<0xFF800000> : vector<8xf32>
    %42 = vector.multi_reduction <maximumf>, %41, %cst_17 [1] : vector<8x8xf32> to vector<8xf32>
    %43 = vector.shape_cast %42 : vector<8xf32> to vector<8x1xf32>
    %44 = vector.broadcast %43 : vector<8x1xf32> to vector<8x8xf32>
    %45 = arith.subf %41, %44 : vector<8x8xf32>
    %46 = math.exp %45 : vector<8x8xf32>
    %cst_18 = arith.constant dense<0.000000e+00> : vector<8xf32>
    %47 = vector.multi_reduction <add>, %46, %cst_18 [1] : vector<8x8xf32> to vector<8xf32>
    %48 = vector.shape_cast %47 : vector<8xf32> to vector<8x1xf32>
    %49 = arith.truncf %46 : vector<8x8xf32> to vector<8x8xbf16>
    %50 = arith.truncf %33 : vector<8x32xf32> to vector<8x32xbf16>
    %cst_19 = arith.constant dense<0.000000e+00> : vector<8x32xf32>
    %51 = tpu.matmul %49, %50, %cst_19 {dimension_numbers = #tpu.dot_dimension_numbers<[1], [0], [0], [1], [0, 0, 1, 1], [], []>} : vector<8x8xbf16>, vector<8x32xbf16>, vector<8x32xf32> -> vector<8x32xf32>
    %52 = tpu.reciprocal %48 {approx = true} : vector<8x1xf32> -> vector<8x1xf32>
    %53 = vector.broadcast %52 : vector<8x1xf32> to vector<8x32xf32>
    %54 = arith.mulf %51, %53 : vector<8x32xf32>
    %55 = arith.addf %54, %22 : vector<8x32xf32>
    %56 = arith.truncf %55 : vector<8x32xf32> to vector<8x32xbf16>
    %c0_20 = arith.constant 0 : index
    %c0_21 = arith.constant 0 : index
    %57 = vector.load %arg5[%c0_20, %c0_21] : memref<32x32xbf16, #tpu.memory_space<vmem>>, vector<32x32xbf16>
    %cst_22 = arith.constant dense<0.000000e+00> : vector<8x32xf32>
    %58 = tpu.matmul %56, %57, %cst_22 {dimension_numbers = #tpu.dot_dimension_numbers<[1], [0], [0], [1], [0, 0, 1, 1], [], []>} : vector<8x32xbf16>, vector<32x32xbf16>, vector<8x32xf32> -> vector<8x32xf32>
    %c0_23 = arith.constant 0 : index
    %c0_24 = arith.constant 0 : index
    %59 = vector.load %arg6[%c0_23, %c0_24] : memref<1x32xf32, #tpu.memory_space<vmem>>, vector<1x32xf32>
    %60 = vector.broadcast %59 : vector<1x32xf32> to vector<8x32xf32>
    %61 = arith.addf %58, %60 : vector<8x32xf32>
    %62 = arith.addf %61, %0 : vector<8x32xf32>
    %c0_25 = arith.constant 0 : index
    %c0_26 = arith.constant 0 : index
    %63 = vector.load %arg7[%c0_25, %c0_26] : memref<1x32xf32, #tpu.memory_space<vmem>>, vector<1x32xf32>
    %c0_27 = arith.constant 0 : index
    %c0_28 = arith.constant 0 : index
    %64 = vector.load %arg8[%c0_27, %c0_28] : memref<1x32xf32, #tpu.memory_space<vmem>>, vector<1x32xf32>
    %cst_29 = arith.constant dense<0.000000e+00> : vector<8xf32>
    %65 = vector.multi_reduction <add>, %62, %cst_29 [1] : vector<8x32xf32> to vector<8xf32>
    %66 = vector.shape_cast %65 : vector<8xf32> to vector<8x1xf32>
    %cst_30 = arith.constant 3.125000e-02 : f32
    %67 = vector.broadcast %cst_30 : f32 to vector<8x1xf32>
    %68 = arith.mulf %66, %67 : vector<8x1xf32>
    %69 = vector.broadcast %68 : vector<8x1xf32> to vector<8x32xf32>
    %70 = arith.subf %62, %69 : vector<8x32xf32>
    %71 = arith.mulf %70, %70 : vector<8x32xf32>
    %cst_31 = arith.constant dense<0.000000e+00> : vector<8xf32>
    %72 = vector.multi_reduction <add>, %71, %cst_31 [1] : vector<8x32xf32> to vector<8xf32>
    %73 = vector.shape_cast %72 : vector<8xf32> to vector<8x1xf32>
    %cst_32 = arith.constant 3.125000e-02 : f32
    %74 = vector.broadcast %cst_32 : f32 to vector<8x1xf32>
    %75 = arith.mulf %73, %74 : vector<8x1xf32>
    %cst_33 = arith.constant 9.99999974E-6 : f32
    %76 = vector.broadcast %cst_33 : f32 to vector<8x1xf32>
    %77 = arith.addf %75, %76 : vector<8x1xf32>
    %78 = math.rsqrt %77 : vector<8x1xf32>
    %79 = vector.broadcast %78 : vector<8x1xf32> to vector<8x32xf32>
    %80 = arith.mulf %70, %79 : vector<8x32xf32>
    %81 = vector.broadcast %63 : vector<1x32xf32> to vector<8x32xf32>
    %82 = arith.mulf %80, %81 : vector<8x32xf32>
    %83 = vector.broadcast %64 : vector<1x32xf32> to vector<8x32xf32>
    %84 = arith.addf %82, %83 : vector<8x32xf32>
    %85 = arith.truncf %84 : vector<8x32xf32> to vector<8x32xbf16>
    %c0_34 = arith.constant 0 : index
    %c0_35 = arith.constant 0 : index
    %86 = vector.load %arg9[%c0_34, %c0_35] : memref<32x64xbf16, #tpu.memory_space<vmem>>, vector<32x64xbf16>
    %cst_36 = arith.constant dense<0.000000e+00> : vector<8x64xf32>
    %87 = tpu.matmul %85, %86, %cst_36 {dimension_numbers = #tpu.dot_dimension_numbers<[1], [0], [0], [1], [0, 0, 1, 1], [], []>} : vector<8x32xbf16>, vector<32x64xbf16>, vector<8x64xf32> -> vector<8x64xf32>
    %c0_37 = arith.constant 0 : index
    %c0_38 = arith.constant 0 : index
    %88 = vector.load %arg10[%c0_37, %c0_38] : memref<1x64xf32, #tpu.memory_space<vmem>>, vector<1x64xf32>
    %89 = vector.broadcast %88 : vector<1x64xf32> to vector<8x64xf32>
    %90 = arith.addf %87, %89 : vector<8x64xf32>
    %cst_39 = arith.constant 0.000000e+00 : f32
    %91 = vector.broadcast %cst_39 : f32 to vector<8x64xf32>
    %92 = arith.maximumf %90, %91 : vector<8x64xf32>
    %93 = arith.truncf %92 : vector<8x64xf32> to vector<8x64xbf16>
    %c0_40 = arith.constant 0 : index
    %c0_41 = arith.constant 0 : index
    %94 = vector.load %arg11[%c0_40, %c0_41] : memref<64x32xbf16, #tpu.memory_space<vmem>>, vector<64x32xbf16>
    %cst_42 = arith.constant dense<0.000000e+00> : vector<8x32xf32>
    %95 = tpu.matmul %93, %94, %cst_42 {dimension_numbers = #tpu.dot_dimension_numbers<[1], [0], [0], [1], [0, 0, 1, 1], [], []>} : vector<8x64xbf16>, vector<64x32xbf16>, vector<8x32xf32> -> vector<8x32xf32>
    %c0_43 = arith.constant 0 : index
    %c0_44 = arith.constant 0 : index
    %96 = vector.load %arg12[%c0_43, %c0_44] : memref<1x32xf32, #tpu.memory_space<vmem>>, vector<1x32xf32>
    %97 = vector.broadcast %96 : vector<1x32xf32> to vector<8x32xf32>
    %98 = arith.addf %95, %97 : vector<8x32xf32>
    %99 = arith.addf %98, %62 : vector<8x32xf32>
    %c0_45 = arith.constant 0 : index
    %c0_46 = arith.constant 0 : index
    %100 = vector.load %arg13[%c0_45, %c0_46] : memref<8x32xf32, #tpu.memory_space<vmem>>, vector<8x32xf32>
    tpu.vector_store %arg13[%c0_45, %c0_46], %99 {strides = array<i32>} : memref<8x32xf32, #tpu.memory_space<vmem>>, vector<8x32xf32>,
    return
  }
}

</mosaic_0001>

<bundles_post_ra>
// kernel: tpu_custom_call.1
= control target key start
LH: loop header
LB: loop body
LE: loop exit
PB: predicated region body
PF: predicated region fallthrough
CT: control target
= control target key end

     0   :  { %18 = vsyncpa [#allocation3], 0  ;;  %s906_s0 = inlined_call_operand.hbm [shape: f32[8,32], index: 0, kind: input, shape index: {}]   ;;  %s907_s1 = inlined_call_operand.vmem [shape: f32[1,32], index: 1, kind: input, shape index: {}]   ;;  %s908_s2 = inlined_call_operand.vmem [shape: f32[1,32], index: 2, kind: input, shape index: {}]   ;;  %s909_s3 = inlined_call_operand.vmem [shape: bf16[32,96], index: 3, kind: input, shape index: {}]   ;;  %s910_s4 = inlined_call_operand.vmem [shape: f32[1,96], index: 4, kind: input, shape index: {}]   ;;  %s911_s5 = inlined_call_operand.vmem [shape: bf16[32,32], index: 5, kind: input, shape index: {}]   ;;  %s912_s6 = inlined_call_operand.vmem [shape: f32[1,32], index: 6, kind: input, shape index: {}]   ;;  %s913_s7 = inlined_call_operand.vmem [shape: f32[1,32], index: 7, kind: input, shape index: {}]   ;;  %s914_s8 = inlined_call_operand.vmem [shape: f32[1,32], index: 8, kind: input, shape index: {}]   ;;  %s915_s9 = inlined_call_operand.vmem [shape: bf16[32,64], index: 9, kind: input, shape index: {}]   ;;  %s916_s10 = inlined_call_operand.vmem [shape: f32[1,64], index: 10, kind: input, shape index: {}]   ;;  %s917_s11 = inlined_call_operand.vmem [shape: bf16[64,32], index: 11, kind: input, shape index: {}]   ;;  %s918_s12 = inlined_call_operand.vmem [shape: f32[1,32], index: 12, kind: input, shape index: {}]   ;;  %s919_s13 = inlined_call_operand.hbm [shape: f32[8,32], index: 13, kind: output, shape index: {}]  }
   0x1   :  { %19 = vsyncpa [#allocation4], 0  ;;  %s705_s25 = smov [#allocation2]   ;;  %s657_s29 = scalar_lea.hbm %s906_s0, 128 }
   0x2   :  { %s26_s26 = sshll.u32 %s705_s25, 4  ;;  %p658_p0 = scmp.ne.s32.totalorder %s906_s0, %s657_s29  ;;  %s27_s26 = int_to_ptr.vmem [resolvable:$true] %s26_s26 }
   0x3   :  { %p661_p1 = scmp.lt.u32.totalorder %s657_s29, %s906_s0 }
   0x5   :  { %p663_p2 = pnand %p661_p1, %p658_p0 }
   0x7   :  { %666 = shalt.err (!%p663_p2)
}
   0x8   :  { %s667_s17 = scalar_lea.vmem %s27_s26, 128  ;;  %p672_p4 = scmp.lt.s32.totalorder %s27_s26, %s27_s26 }
   0x9   :  { %p668_p3 = scmp.ne.s32.totalorder %s27_s26, %s667_s17  ;;  %p673_p5 = scmp.lt.s32.totalorder %s667_s17, %s667_s17 }
   0xb   :  { %p674_p6 = por %p673_p5, %p672_p4 }
   0xd   :  { %p675_p7 = pnand %p674_p6, %p668_p3 }
   0xf   :  { %678 = shalt.err (!%p675_p7)
}
  0x10   :  { %29 = dma.hbm_to_vmem [thread:$0]  %s906_s0, 128, %s27_s26, [#allocation3]  }
  0x11   :  { %701 = dma.done.wait [#allocation3], 128  }
  0x12   :  { %702 = vsyncadd [#allocation3], 4294967168  ;;  %vm61_vm0 = vcmask 261120   ;;  %v793_v0 = vld [vmem:[#allocation2] sm:$0xff]  ;;  %v706_v8 = vmov 0.0   ;;  %v640_v9 = vld [vmem:[%s909_s3 + $0x8] sm:$0xff]   ;;  %v208_v33 = vlaneseq }
  0x13   :  { %v62_v1 = vsel %vm61_vm0, %v793_v0, 0.0  ;;  %v639_v7 = vld [vmem:[%s909_s3] sm:$0xff]   ;;  %585 = vmatprep.subr.bf16.mxu0 %v706_v8  ;;  %593 = vmatprep.subr.bf16.mxu1 %v706_v8  ;;  %vm707_vm1 = vmmov 0   ;;  %vm230_vm2 = vcmask 1043456   ;;  %vm214_vm4 = vcmask 64512   ;;  %v642_v49 = vld [vmem:[%s911_s5 + $0x8] sm:$0xff]  }
  0x14   :  { %63 = vadd.xlane.f32.xlu0 %v62_v1  ;;  %586 = vmatpush3.bf16.msra.mxu0 %v639_v7  ;;  %v543_v14 = vld [vmem:[%s907_s1] ss:$0 sm:$0xff]  ;;  %s708_s1 = smov 64   ;;  %v209_v34 = vshrl.u32 %v208_v33, 7  ;;  %v211_v35 = vand.u32 127, %v208_v33  ;;  %vm482_vm5 = vcmask 523264  }
  0x15   :  { %589 = vmatprep.mubr.msk.bf16.mxu0 %vm707_vm1, %v706_v8  ;;  %587 = vmatprep.subr.bf16.mxu0 %v706_v8  ;;  %v544_v16 = vld [vmem:[%s908_s2] ss:$0 sm:$0xff]  ;;  %s709_s2 = smov 96  }
  0x16   :  { %595 = vmatprep.mubr.msk.bf16.mxu1 %vm707_vm1, %v706_v8  ;;  %v545_v20 = vld [vmem:[%s910_s4] ss:$0 sm:$0xff]  ;;  %vm212_vm3 = vcmp.le.s32.totalorder %v211_v35, %v209_v34 }
  0x17   :  { %v641_v48 = vld [vmem:[%s911_s5] sm:$0xff]  }
  0x18   :  { %588 = vmatpush3.bf16.msra.mxu0 %v640_v9  ;;  %v551_v59 = vld [vmem:[%s912_s6] ss:$0 sm:$0xff] }
  0x19   :  { %599 = vmatprep.subr.bf16.mxu0 %v706_v8 }
  0xa1   :  { %v64_v2 = vpop.xlane.xlu0 %63 }
  0xa2   :  { %v65_v3 = vmul.f32 0.03125, %v64_v2 }
  0xa4   :  { %v66_v4 = vsub.f32 %v793_v0, %v65_v3 }
  0xa6   :  { %v67_v5 = vmul.f32 %v66_v4, %v66_v4 }
  0xa8   :  { %v68_v6 = vsel %vm61_vm0, %v67_v5, 0.0 }
  0xa9   :  { %69 = vadd.xlane.f32.xlu0 %v68_v6 }
 0x136   :  { %v70_v10 = vpop.xlane.xlu0 %69 }
 0x137   :  { %v71_v11 = vmul.f32 0.03125, %v70_v10  ;;  %v643_v10 = vld [vmem:[%s915_s9] sm:$0xff]  }
 0x139   :  { %v72_v12 = vadd.f32 1e-05, %v71_v11  ;;  %v645_v11 = vld [vmem:[%s917_s11] sm:$0xff]  }
 0x13b   :  { %649 = vrsqrt.f32 %v72_v12  ;;  %v646_v12 = vld [vmem:[%s917_s11 + $0x8] sm:$0xff]  }
 0x145   :  { %v650_v13 = vpop.eup %649 }
 0x146   :  { %v74_v15 = vmul.f32 %v650_v13, %v66_v4 }
 0x148   :  { %v81_v17 = vmul.f32 %v543_v14, %v74_v15 }
 0x14a   :  { %v819_v18 = vadd.f32 %v544_v16, %v81_v17  ;;  %v555_v17 = vld [vmem:[%s913_s7] ss:$0 sm:$0xff] }
 0x14c   :  { %v89_v19 = vpack.c.bf16 %v819_v18, %v819_v18 }
 0x14e   :  { %590 = vmatmul.mubr.msk.bf16.vlgmr.msra.gmra.mrb[0].mxu0 %vm61_vm0, %v89_v19  ;;  %v556_v19 = vld [vmem:[%s914_s8] ss:$0 sm:$0xff] }
 0x14f   :  { %601 = vmatprep.mubr.msk.bf16.mxu0 %vm707_vm1, %v706_v8 }
 0x221   :  { %v150_v21 = vpop.f32.mrb[0].mxu0 }
 0x222   :  { %v151_v22 = vadd.f32 %v545_v20, %v150_v21  ;;  %v591_v23 = vpop.f32.mrb[1].mxu0 }
 0x223   :  { %v153_v24 = vpop.f32.mrb[2].mxu0  ;;  %v647_v23 = vld [vmem:[%s917_s11 + $0x10] sm:$0xff]  }
 0x224   :  { %v158_v25 = vpack.c.bf16 %v151_v22, %v151_v22  ;;  %v592_v26 = vpop.f32.mrb[3].mxu0  ;;  %v156_v31 = vmul.f32 0.35355338, %v151_v22  ;;  %v648_v24 = vld [vmem:[%s917_s11 + $0x18] sm:$0xff]   ;;  %s710_s11 = smov [#allocation5]  }
 0x226   :  { %225 = vrot.lane.b32.xlu0 %v158_v25, %s708_s1  ;;  %160 = vrot.lane.b32.xlu1 %v158_v25, %s709_s2  ;;  %v157_v32 = vpack.c.bf16 %v156_v31, %v156_v31  ;;  %v557_v25 = vld [vmem:[%s916_s10] ss:$0 sm:$0xff]  ;;  %s534_s2 = sshll.u32 %s710_s11, 4  ;;  %s535_s2 = int_to_ptr.vmem [resolvable:$true] %s534_s2 }
 0x227   :  { %s679_s10 = scalar_lea.vmem %s535_s2, 128  ;;  %p684_p9 = scmp.lt.s32.totalorder %s535_s2, %s535_s2 }
 0x228   :  { %p680_p8 = scmp.ne.s32.totalorder %s535_s2, %s679_s10  ;;  %p685_p10 = scmp.lt.s32.totalorder %s679_s10, %s679_s10 }
 0x22a   :  { %p686_p11 = por %p685_p10, %p684_p9 }
 0x22c   :  { %p687_p12 = pnand %p686_p11, %p680_p8 }
 0x298   :  { %v226_v27 = vpop.permute.xlu0 %225  ;;  %v161_v28 = vpop.permute.xlu1 %160 }
 0x299   :  { %v232_v29 = vsel %vm230_vm2, %v226_v27, 0  ;;  %v166_v30 = vsel %vm61_vm0, %v161_v28, 0 }
 0x29a   :  { %594 = vmatpush3.bf16.xpose.msra.mxu1 %v166_v30  ;;  %600 = vmatpush3.bf16.msra.mxu0 %v232_v29 }
 0x29b   :  { %605 = vmatprep.subr.bf16.mxu1 %v706_v8  ;;  %613 = vmatprep.subr.bf16.mxu0 %v706_v8 }
 0x2a1   :  { %596 = vmatmul.mubr.msk.bf16.vlgmr.msra.gmra.mrb[0].mxu1 %vm61_vm0, %v157_v32 }
 0x2a2   :  { %609 = vmatprep.mubr.msk.bf16.mxu1 %vm707_vm1, %v706_v8  ;;  %606 = vmatpush3.bf16.msra.mxu1 %v641_v48 }
 0x2a3   :  { %607 = vmatprep.subr.bf16.mxu1 %v706_v8 }
 0x2a6   :  { %608 = vmatpush3.bf16.msra.mxu1 %v642_v49 }
 0x2a7   :  { %621 = vmatprep.subr.bf16.mxu1 %v706_v8 }
 0x374   :  { %v202_v36 = vpop.f32.mrb[0].mxu1 }
 0x375   :  { %v213_v37 = vsel %vm212_vm3, -1e+09, %v202_v36  ;;  %v597_v38 = vpop.f32.mrb[1].mxu1 }
 0x376   :  { %v205_v39 = vpop.f32.mrb[2].mxu1  ;;  %v215_v40 = vsel %vm214_vm4, %v213_v37, -inf }
 0x377   :  { %216 = vmax.xlane.f32.xlu1 %v215_v40  ;;  %v598_v41 = vpop.f32.mrb[3].mxu1 }
 0x404   :  { %v217_v42 = vpop.xlane.xlu1 %216 }
 0x405   :  { %v218_v43 = vsub.f32 %v213_v37, %v217_v42 }
 0x407   :  { %v219_v44 = vmul.f32 1.442695, %v218_v43 }
 0x409   :  { %651 = vpow2.f32 %v219_v44 }
 0x413   :  { %v652_v45 = vpop.eup %651 }
 0x414   :  { %v221_v46 = vsel %vm214_vm4, %v652_v45, 0.0  ;;  %v224_v47 = vpack.c.bf16 %v652_v45, %v652_v45 }
 0x415   :  { %222 = vadd.xlane.f32.xlu0 %v221_v46 }
 0x416   :  { %602 = vmatmul.mubr.msk.bf16.vlgmr.msra.gmra.mrb[4].mxu0 %vm214_vm4, %v224_v47 }
 0x417   :  { %617 = vmatprep.mubr.msk.bf16.mxu0 %vm707_vm1, %v706_v8  ;;  %614 = vmatpush3.bf16.msra.mxu0 %v643_v10 }
 0x418   :  { %615 = vmatprep.subr.bf16.mxu0 %v706_v8 }
 0x4a2   :  { %v223_v50 = vpop.xlane.xlu0 %222 }
 0x4a3   :  { %653 = vrcp.f32 %v223_v50 }
 0x4ad   :  { %v654_v51 = vpop.eup %653 }
 0x4e9   :  { %v268_v52 = vpop.f32.mrb[4].mxu0 }
 0x4ea   :  { %v275_v53 = vmul.f32 %v654_v51, %v268_v52  ;;  %v603_v54 = vpop.f32.mrb[5].mxu0 }
 0x4eb   :  { %v271_v55 = vpop.f32.mrb[6].mxu0 }
 0x4ec   :  { %v276_v56 = vadd.f32 %v275_v53, %v819_v18  ;;  %v604_v57 = vpop.f32.mrb[7].mxu0 }
 0x4ee   :  { %v277_v58 = vpack.c.bf16 %v276_v56, %v276_v56 }
 0x4f0   :  { %610 = vmatmul.mubr.msk.bf16.vlgmr.msra.gmra.mrb[4].mxu1 %vm61_vm0, %v277_v58 }
 0x4f1   :  { %629 = vmatprep.mubr.msk.bf16.mxu1 %vm707_vm1, %v706_v8  ;;  %622 = vmatpush3.bf16.msra.mxu1 %v645_v11 }
 0x4f2   :  { %623 = vmatprep.subr.bf16.mxu1 %v706_v8 }
 0x4f5   :  { %624 = vmatpush3.bf16.msra.mxu1 %v646_v12 }
 0x4f6   :  { %625 = vmatprep.subr.bf16.mxu1 %v706_v8 }
 0x4f9   :  { %626 = vmatpush3.bf16.msra.mxu1 %v647_v23 }
 0x4fa   :  { %627 = vmatprep.subr.bf16.mxu1 %v706_v8  ;;  %v561_v8 = vld [vmem:[%s918_s12] ss:$0 sm:$0xff] }
 0x4fd   :  { %628 = vmatpush3.bf16.msra.mxu1 %v648_v24 }
 0x5c3   :  { %v338_v60 = vpop.f32.mrb[4].mxu1 }
 0x5c4   :  { %v339_v61 = vadd.f32 %v551_v59, %v338_v60  ;;  %v611_v62 = vpop.f32.mrb[5].mxu1 }
 0x5c5   :  { %v341_v63 = vpop.f32.mrb[6].mxu1 }
 0x5c6   :  { %v344_v1 = vadd.f32 %v339_v61, %v793_v0  ;;  %v612_v2 = vpop.f32.mrb[7].mxu1  ;;  %v644_v0 = vld [vmem:[%s915_s9 + $0x8] sm:$0xff]  }
 0x5c7   :  { %616 = vmatpush3.bf16.msra.mxu0 %v644_v0 }
 0x5c8   :  { %v347_v3 = vsel %vm61_vm0, %v344_v1, 0.0 }
 0x5c9   :  { %348 = vadd.xlane.f32.xlu1 %v347_v3 }
 0x656   :  { %v349_v4 = vpop.xlane.xlu1 %348 }
 0x657   :  { %v350_v5 = vmul.f32 0.03125, %v349_v4 }
 0x659   :  { %v351_v6 = vsub.f32 %v344_v1, %v350_v5 }
 0x65b   :  { %v352_v7 = vmul.f32 %v351_v6, %v351_v6 }
 0x65d   :  { %v353_v9 = vsel %vm61_vm0, %v352_v7, 0.0 }
 0x65e   :  { %354 = vadd.xlane.f32.xlu1 %v353_v9 }
 0x6eb   :  { %v355_v13 = vpop.xlane.xlu1 %354 }
 0x6ec   :  { %v356_v14 = vmul.f32 0.03125, %v355_v13 }
 0x6ee   :  { %v357_v15 = vadd.f32 1e-05, %v356_v14 }
 0x6f0   :  { %655 = vrsqrt.f32 %v357_v15 }
 0x6fa   :  { %v656_v16 = vpop.eup %655 }
 0x6fb   :  { %v359_v18 = vmul.f32 %v656_v16, %v351_v6 }
 0x6fd   :  { %v366_v20 = vmul.f32 %v555_v17, %v359_v18 }
 0x6ff   :  { %v373_v21 = vadd.f32 %v556_v19, %v366_v20 }
 0x701   :  { %v374_v22 = vpack.c.bf16 %v373_v21, %v373_v21 }
 0x703   :  { %618 = vmatmul.mubr.msk.bf16.vlgmr.msra.gmra.mrb[8].mxu0 %vm61_vm0, %v374_v22 }
 0x7d6   :  { %v435_v26 = vpop.f32.mrb[8].mxu0 }
 0x7d7   :  { %v436_v27 = vadd.f32 %v557_v25, %v435_v26  ;;  %v619_v28 = vpop.f32.mrb[9].mxu0 }
 0x7d8   :  { %v438_v29 = vpop.f32.mrb[10].mxu0 }
 0x7d9   :  { %v441_v30 = vmax.f32 %v436_v27, 0.0  ;;  %v620_v31 = vpop.f32.mrb[11].mxu0 }
 0x7db   :  { %v442_v32 = vpack.c.bf16 %v441_v30, %v441_v30 }
 0x7dd   :  { %630 = vmatmul.mubr.msk.bf16.vlgmr.msra.gmra.mrb[8].mxu1 %vm482_vm5, %v442_v32 }
 0x8b0   :  { %v520_v33 = vpop.f32.mrb[8].mxu1 }
 0x8b1   :  { %v521_v34 = vadd.f32 %v561_v8, %v520_v33  ;;  %v631_v35 = vpop.f32.mrb[9].mxu1 }
 0x8b2   :  { %v523_v36 = vpop.f32.mrb[10].mxu1 }
 0x8b3   :  { %v526_v37 = vadd.f32 %v521_v34, %v344_v1  ;;  %v632_v38 = vpop.f32.mrb[11].mxu1 }
 0x8b5   :  { %527 = vst.msk [vmem:[#allocation5] sm:$0xff] %vm61_vm0, %v526_v37 }
 0x8b6   :  { %690 = shalt.err (!%p687_p12)
}
 0x8b7   :  { %s691_s28 = scalar_lea.hbm %s919_s13, 128 }
 0x8b8   :  { %p692_p13 = scmp.ne.s32.totalorder %s919_s13, %s691_s28  ;;  %p695_p0 = scmp.lt.u32.totalorder %s691_s28, %s919_s13 }
 0x8ba   :  { %p697_p1 = pnand %p695_p0, %p692_p13 }
 0x8bc   :  { %700 = shalt.err (!%p697_p1)
}
 0x8bd   :  { %537 = dma.vmem_to_hbm [thread:$0]  %s535_s2, 128, %s919_s13, [#allocation4]  }
 0x8be   :  { %703 = dma.done.wait [#allocation4], 128  }
 0x8bf   :  { %704 = vsyncadd [#allocation4], 4294967168 }
 0x8c0   :  { %541 = vsyncpa [#allocation3], 1 }
 0x8c1   :  { %542 = vsyncpa [#allocation4], 1 }

</bundles_post_ra>
